<compile_context>
chip_gen: v7x
topology: tpu7x:2x2x1
jax: 0.10.0
libtpu: 0.0.40
codegen_flags: <defaults>
</compile_context>

<pallas_src>
import jax
import jax.numpy as jnp
import numpy as np
from jax.experimental import pallas as pl
from jax.experimental.pallas import tpu as pltpu

BN_EPS = 1e-5


# ---------------------------- BN folding (== Conv2d_BN.fuse) ----------------------------

def _fuse_bn(w_oi, gamma, beta, mean, var):
    # w_oi: (out, in) 1x1-conv weight; BN over the out channels.
    s = gamma / jnp.sqrt(var + BN_EPS)                         # (out,)
    w_f = w_oi * s[:, None]                                    # (out, in)
    b_f = (beta - mean * s)[:, None]                           # (out, 1)
    return w_f, b_f


# ---------------------------- fused Pallas kernel ----------------------------

def _ffn_kernel(x_ref, wt1_ref, b1_ref, wt2_ref, b2_ref, o_ref):
    # x_ref : (1, ed, tn)  f32 block of the input, pixels on the lane axis
    # wt1   : (hid, ed)    bf16 fused pw1 weight
    # b1    : (hid, 1)     f32  fused pw1 bias
    # wt2   : (ed, hid)    bf16 fused pw2 weight
    # b2    : (ed, 1)      f32  fused pw2 bias
    # o_ref : (1, ed, tn)
    xb = x_ref[0].astype(jnp.bfloat16)                                    # (ed, tn) -> MXU dtype

    # pw1 (1x1 conv + folded BN) on the MXU, f32 accumulate.
    h = jnp.dot(wt1_ref[...], xb, preferred_element_type=jnp.float32)     # (hid, tn)
    h = jnp.maximum(h + b1_ref[...], 0.0)                                 # bias + ReLU in f32 (VPU)

    # pw2 (1x1 conv + folded BN); hidden activation never leaves VMEM.
    o = jnp.dot(wt2_ref[...], h.astype(jnp.bfloat16),
                preferred_element_type=jnp.float32)                       # (ed, tn)
    o_ref[0] = (o + b2_ref[...]).astype(o_ref.dtype)


def ffn_forward(x_nchw, p, block_hw=None):
    """x_nchw: (B, ed, H, W) float32.  Returns (B, ed, H, W) float32."""
    B, ed, H, W = x_nchw.shape
    hid = p['wt1'].shape[0]
    HW = H * W

    if block_hw is None:
        # Lane-dense tile of the pixel axis (multiple of 128 when possible).
        block_hw = min(512, HW) if HW % 128 == 0 else HW

    x = x_nchw.reshape(B, ed, HW)                                         # metadata-only reshape
    grid = (B, pl.cdiv(HW, block_hw))

    out = pl.pallas_call(
        _ffn_kernel,
        out_shape=jax.ShapeDtypeStruct((B, ed, HW), x_nchw.dtype),
        grid_spec=pltpu.PrefetchScalarGridSpec(
            num_scalar_prefetch=0,
            grid=grid,
            in_specs=[
                pl.BlockSpec((1, ed, block_hw), lambda b, j: (b, 0, j)),  # x tile
                pl.BlockSpec((hid, ed), lambda b, j: (0, 0)),             # wt1 (resident)
                pl.BlockSpec((hid, 1), lambda b, j: (0, 0)),              # b1
                pl.BlockSpec((ed, hid), lambda b, j: (0, 0)),             # wt2
                pl.BlockSpec((ed, 1), lambda b, j: (0, 0)),               # b2
            ],
            out_specs=pl.BlockSpec((1, ed, block_hw), lambda b, j: (b, 0, j)),
        ),
        compiler_params=pltpu.CompilerParams(
            dimension_semantics=("parallel", "parallel"),   # megacore split on v7x
            vmem_limit_bytes=32 * 1024 * 1024,              # safe on v5e/v6e/v7x
        ),
    )(x, p['wt1'], p['b1'], p['wt2'], p['b2'])

    return out.reshape(B, ed, H, W)


# ---------------------------- parameters ----------------------------

def init_params(key, ed, hid):
    ks = jax.random.split(key, 4)
    raw_w1 = 0.1 * jax.random.normal(ks[0], (hid, ed), jnp.float32)   # pw1.c.weight[:,:,0,0]
    raw_w2 = 0.1 * jax.random.normal(ks[1], (ed, hid), jnp.float32)   # pw2.c.weight[:,:,0,0]

    # Synthetic eval-mode BN statistics.  NOTE: the module's literal __init__ defaults
    # (pw2 bn_weight_init=0, zero running stats) would make the whole forward output
    # identically zero; non-trivial BN params are used so the numerical check is
    # meaningful.  The folding math is identical to Conv2d_BN.fuse().
    def bn_params(k, n):
        a, b, c, d = jax.random.split(k, 4)
        gamma = 1.0 + 0.1 * jax.random.normal(a, (n,), jnp.float32)
        beta = 0.1 * jax.random.normal(b, (n,), jnp.float32)
        mean = 0.1 * jax.random.normal(c, (n,), jnp.float32)
        var = 1.0 + 0.1 * jnp.abs(jax.random.normal(d, (n,), jnp.float32))
        return gamma, beta, mean, var

    bn1 = bn_params(ks[2], hid)
    bn2 = bn_params(ks[3], ed)

    w1f, b1f = _fuse_bn(raw_w1, *bn1)     # (hid, ed), (hid, 1)
    w2f, b2f = _fuse_bn(raw_w2, *bn2)     # (ed, hid), (ed, 1)

    return dict(
        wt1=w1f.astype(jnp.bfloat16), b1=b1f,       # kernel-facing (bf16 MXU weights)
        wt2=w2f.astype(jnp.bfloat16), b2=b2f,
        raw_w1=raw_w1, raw_w2=raw_w2, bn1=bn1, bn2=bn2,   # for the module-faithful reference
    )


# ---------------------------- pure-JAX references ----------------------------

def reference_fused_bf16(x_nchw, p):
    """Same math as the kernel (bf16 MXU inputs, f32 accumulate) -> tight tolerance."""
    B, ed, H, W = x_nchw.shape
    x = x_nchw.reshape(B, ed, H * W).astype(jnp.bfloat16)
    h = jnp.einsum('he,bep->bhp', p['wt1'], x, preferred_element_type=jnp.float32)
    h = jnp.maximum(h + p['b1'][None], 0.0)
    o = jnp.einsum('eh,bhp->bep', p['wt2'], h.astype(jnp.bfloat16),
                   preferred_element_type=jnp.float32)
    o = o + p['b2'][None]
    return o.reshape(B, ed, H, W).astype(x_nchw.dtype)


def reference_module_f32(x_nchw, p):
    """Module-faithful f32 reference: conv1x1 -> BN -> ReLU -> conv1x1 -> BN (eval mode)."""
    B, ed, H, W = x_nchw.shape
    x = x_nchw.reshape(B, ed, H * W).astype(jnp.float32)
    hp = jax.lax.Precision.HIGHEST

    def bn(v, gamma, beta, mean, var):                # v: (B, C, P), BN over C
        s = gamma / jnp.sqrt(var + BN_EPS)
        return v * s[None, :, None] + (beta - mean * s)[None, :, None]

    h = jnp.einsum('he,bep->bhp', p['raw_w1'], x, precision=hp)
    h = jnp.maximum(bn(h, *p['bn1']), 0.0)
    o = jnp.einsum('eh,bhp->bep', p['raw_w2'], h, precision=hp)
    o = bn(o, *p['bn2'])
    return o.reshape(B, ed, H, W)


# ---------------------------- test ----------------------------

if __name__ == "__main__":
    key = jax.random.PRNGKey(0)
    k_x, k_p = jax.random.split(key)

    ed, hid = 4, 32                      # FFN(ed=4, h=32)
    B, H, W = 2, 16, 16
    x = jax.random.normal(k_x, (B, ed, H, W), jnp.float32)     # NCHW input
    params = init_params(k_p, ed, hid)

    # block_hw=128 -> grid (B, 2): exercises the pipelined multi-step grid.
    out = jax.block_until_ready(ffn_forward(x, params, block_hw=128))
    assert out.shape == (B, ed, H, W)

    # 1) exact-math check vs a reference performing the identical bf16/f32 computation
    ref_exact = jax.block_until_ready(reference_fused_bf16(x, params))
    np.testing.assert_allclose(np.asarray(out), np.asarray(ref_exact), rtol=1e-3, atol=1e-3)

    # 2) semantics check vs the module-faithful f32 forward (BN unfused); loose tol
    #    accounts only for the intentional bf16 MXU inputs.
    ref_f32 = jax.block_until_ready(reference_module_f32(x, params))
    np.testing.assert_allclose(np.asarray(out), np.asarray(ref_f32), rtol=2e-2, atol=2e-2)

    print("KERNEL_OK")
</pallas_src>

<mosaic_0001>
module attributes {stable_mosaic.version = 11 : i64} {
  func.func @_ffn_kernel(%arg0: i32, %arg1: i32, %arg2: memref<1x4x128xf32, #tpu.memory_space<vmem>>, %arg3: memref<32x4xbf16, #tpu.memory_space<vmem>>, %arg4: memref<32x1xf32, #tpu.memory_space<vmem>>, %arg5: memref<4x32xbf16, #tpu.memory_space<vmem>>, %arg6: memref<4x1xf32, #tpu.memory_space<vmem>>, %arg7: memref<1x4x128xf32, #tpu.memory_space<vmem>>) attributes {dimension_semantics = [#tpu.dimension_semantics<parallel>, #tpu.dimension_semantics<parallel>], iteration_bounds = array<i64: 2, 2>, scalar_prefetch = 0 : i64, scratch_operands = 0 : i64, tpu.core_type = #tpu.core_type<tc>, window_params = [{transform_indices = @transform_0, window_bounds = array<i64: 1, 4, 128>}, {pipeline_mode = #tpu.pipeline_mode<synchronous>, transform_indices = @transform_1, window_bounds = array<i64: 32, 4>}, {pipeline_mode = #tpu.pipeline_mode<synchronous>, transform_indices = @transform_2, window_bounds = array<i64: 32, 1>}, {pipeline_mode = #tpu.pipeline_mode<synchronous>, transform_indices = @transform_3, window_bounds = array<i64: 4, 32>}, {pipeline_mode = #tpu.pipeline_mode<synchronous>, transform_indices = @transform_4, window_bounds = array<i64: 4, 1>}, {transform_indices = @transform_5, window_bounds = array<i64: 1, 4, 128>}]} {
    %c0 = arith.constant 0 : index
    %c0_0 = arith.constant 0 : index
    %c0_1 = arith.constant 0 : index
    %0 = vector.load %arg2[%c0, %c0_0, %c0_1] : memref<1x4x128xf32, #tpu.memory_space<vmem>>, vector<1x4x128xf32>
    %1 = vector.shape_cast %0 : vector<1x4x128xf32> to vector<4x128xf32>
    %2 = arith.truncf %1 : vector<4x128xf32> to vector<4x128xbf16>
    %c0_2 = arith.constant 0 : index
    %c0_3 = arith.constant 0 : index
    %3 = vector.load %arg3[%c0_2, %c0_3] : memref<32x4xbf16, #tpu.memory_space<vmem>>, vector<32x4xbf16>
    %cst = arith.constant dense<0.000000e+00> : vector<32x128xf32>
    %4 = tpu.matmul %3, %2, %cst {dimension_numbers = #tpu.dot_dimension_numbers<[1], [0], [0], [1], [0, 0, 1, 1], [], []>} : vector<32x4xbf16>, vector<4x128xbf16>, vector<32x128xf32> -> vector<32x128xf32>
    %c0_4 = arith.constant 0 : index
    %c0_5 = arith.constant 0 : index
    %5 = vector.load %arg4[%c0_4, %c0_5] : memref<32x1xf32, #tpu.memory_space<vmem>>, vector<32x1xf32>
    %6 = vector.broadcast %5 : vector<32x1xf32> to vector<32x128xf32>
    %7 = arith.addf %4, %6 : vector<32x128xf32>
    %cst_6 = arith.constant 0.000000e+00 : f32
    %8 = vector.broadcast %cst_6 : f32 to vector<32x128xf32>
    %9 = arith.maximumf %7, %8 : vector<32x128xf32>
    %c0_7 = arith.constant 0 : index
    %c0_8 = arith.constant 0 : index
    %10 = vector.load %arg5[%c0_7, %c0_8] : memref<4x32xbf16, #tpu.memory_space<vmem>>, vector<4x32xbf16>
    %11 = arith.truncf %9 : vector<32x128xf32> to vector<32x128xbf16>
    %cst_9 = arith.constant dense<0.000000e+00> : vector<4x128xf32>
    %12 = tpu.matmul %10, %11, %cst_9 {dimension_numbers = #tpu.dot_dimension_numbers<[1], [0], [0], [1], [0, 0, 1, 1], [], []>} : vector<4x32xbf16>, vector<32x128xbf16>, vector<4x128xf32> -> vector<4x128xf32>
    %c0_10 = arith.constant 0 : index
    %c0_11 = arith.constant 0 : index
    %13 = vector.load %arg6[%c0_10, %c0_11] : memref<4x1xf32, #tpu.memory_space<vmem>>, vector<4x1xf32>
    %14 = vector.broadcast %13 : vector<4x1xf32> to vector<4x128xf32>
    %15 = arith.addf %12, %14 : vector<4x128xf32>
    %c0_12 = arith.constant 0 : index
    %c0_13 = arith.constant 0 : index
    %c0_14 = arith.constant 0 : index
    %16 = vector.load %arg7[%c0_12, %c0_13, %c0_14] : memref<1x4x128xf32, #tpu.memory_space<vmem>>, vector<1x4x128xf32>
    %17 = vector.shape_cast %16 : vector<1x4x128xf32> to vector<4x128xf32>
    %18 = vector.shape_cast %15 : vector<4x128xf32> to vector<1x4x128xf32>
    tpu.vector_store %arg7[%c0_12, %c0_13, %c0_14], %18 {strides = array<i32>} : memref<1x4x128xf32, #tpu.memory_space<vmem>>, vector<1x4x128xf32>,
    return
  }
  func.func @transform_0(%arg0: i32, %arg1: i32) -> (i32, i32, i32) {
    %c0_i32 = arith.constant 0 : i32
    %c0_i32_0 = arith.constant 0 : i32
    return %arg0, %c0_i32, %arg1 : i32, i32, i32
  }
  func.func @transform_1(%arg0: i32, %arg1: i32) -> (i32, i32) {
    %c0_i32 = arith.constant 0 : i32
    %c0_i32_0 = arith.constant 0 : i32
    %c0_i32_1 = arith.constant 0 : i32
    return %c0_i32, %c0_i32_0 : i32, i32
  }
  func.func @transform_2(%arg0: i32, %arg1: i32) -> (i32, i32) {
    %c0_i32 = arith.constant 0 : i32
    %c0_i32_0 = arith.constant 0 : i32
    %c0_i32_1 = arith.constant 0 : i32
    return %c0_i32, %c0_i32_0 : i32, i32
  }
  func.func @transform_3(%arg0: i32, %arg1: i32) -> (i32, i32) {
    %c0_i32 = arith.constant 0 : i32
    %c0_i32_0 = arith.constant 0 : i32
    %c0_i32_1 = arith.constant 0 : i32
    return %c0_i32, %c0_i32_0 : i32, i32
  }
  func.func @transform_4(%arg0: i32, %arg1: i32) -> (i32, i32) {
    %c0_i32 = arith.constant 0 : i32
    %c0_i32_0 = arith.constant 0 : i32
    %c0_i32_1 = arith.constant 0 : i32
    return %c0_i32, %c0_i32_0 : i32, i32
  }
  func.func @transform_5(%arg0: i32, %arg1: i32) -> (i32, i32, i32) {
    %c0_i32 = arith.constant 0 : i32
    %c0_i32_0 = arith.constant 0 : i32
    return %arg0, %c0_i32, %arg1 : i32, i32, i32
  }
}

</mosaic_0001>

<bundles_post_ra>
// kernel: tpu_custom_call.1
= control target key start
LH: loop header
LB: loop body
LE: loop exit
PB: predicated region body
PF: predicated region fallthrough
CT: control target
= control target key end

     0   :  { %10 = vsyncpa [#allocation3], 0  ;;  %s911_s0 = inlined_call_operand.vmem [shape: f32[2,4,256], index: 0, kind: input, shape index: {}]   ;;  %s912_s1 = inlined_call_operand.vmem [shape: bf16[32,4], index: 1, kind: input, shape index: {}]   ;;  %s913_s2 = inlined_call_operand.vmem [shape: f32[32,1], index: 2, kind: input, shape index: {}]   ;;  %s914_s3 = inlined_call_operand.vmem [shape: bf16[4,32], index: 3, kind: input, shape index: {}]   ;;  %s915_s4 = inlined_call_operand.vmem [shape: f32[4,1], index: 4, kind: input, shape index: {}]   ;;  %s916_s5 = inlined_call_operand.hbm [shape: f32[2,4,256], index: 5, kind: output, shape index: {}]  }
   0x1   :  { %12 = vsyncpa [#allocation3 + $0x1], 0  ;;  %s748_s18 = smov 0   ;;  %s750_s19 = smov 0  }
   0x2   :  { %s752_s20 = smov 0   ;;  %s754_s21 = smov 0  }
   0x3   :  { %s756_s22 = smov 0   ;;  %s758_s23 = smov 0  }
   0x4   :  { %s760_s24 = smov 0   ;;  %s762_s25 = smov 0  }
   0x5 LB: > { %s501_s26 = sadd.s32 4294967295, %s712_s25   ;;  %s502_s27 = sadd.s32 4294967294, %s712_s25   ;;  %s712_s25 = sphi %s762_s25, %s18_s25   ;;  %s708_s24 = sphi %s760_s24, %s931_s24   ;;  %s704_s23 = sphi %s758_s23, %s930_s23   ;;  %s700_s22 = sphi %s756_s22, %s929_s22   ;;  %s696_s21 = sphi %s754_s21, %s928_s21   ;;  %s692_s20 = sphi %s752_s20, %s927_s20   ;;  %s688_s19 = sphi %s750_s19, %s926_s19   ;;  %s684_s18 = sphi %s748_s18, %s925_s18  }
   0x6   : > { %s27_s28 = sadd.s32 1, %s704_s23  ;;  %s30_s29 = sadd.s32 1, %s708_s24 }
   0x7   : > { %p28_p0 = scmp.ge.s32.totalorder %s27_s28, 2  ;;  %p161_p1 = scmp.ne.s32.totalorder %s692_s20, %s688_s19 }
   0x8   : > { %p162_p2 = scmp.eq.s32.totalorder %s501_s26, 3  ;;  %p167_p5 = scmp.ne.s32.totalorder %s688_s19, %s684_s18 }
   0x9   : > { %s933_s28 = smov (%p28_p0, %s27_s28), 0  ;;  %s935_s29 = smov (!%p28_p0, %s30_s29), %s708_s24 }
   0xa   : > { %919 = sst [smem:[#allocation5_spill]] %s933_s28  ;;  %s147_s30 = ssub.s32 %s704_s23, %s933_s28 }
   0xb   : > { %p799_p3 = por %p162_p2, %p161_p1  ;;  %p32_p4 = scmp.ge.s32.totalorder %s935_s29, 2 }
   0xc   : > { %p168_p6 = scmp.eq.s32.totalorder %s502_s27, 3  ;;  %p505_p7 = scmp.ge.s32.totalorder %s712_s25, 1 }
   0xd   : > { %s937_s29 = smov (%p32_p4, %s935_s29), 0  ;;  %p209_p9 = scmp.lt.s32.totalorder %s712_s25, 5 }
   0xe   : > { %921 = sst [smem:[#allocation6_spill]] %s937_s29  ;;  %p808_p8 = por %p168_p6, %p167_p5 }
   0xf   : > { %s146_s8 = ssub.s32 %s708_s24, %s937_s29  ;;  %s151_s9 = sadd.s32 1, %s692_s20 }
  0x10   : > { %s148_s10 = sor.u32 %s147_s30, %s146_s8  ;;  %p210_p10 = pnand %p505_p7, %p209_p9 }
  0x11   : > { %p149_p11 = scmp.eq.s32.totalorder %s148_s10, 0  ;;  %p240_p12 = scmp.lt.s32.totalorder (!%p210_p10), %s700_s22, 1  ;;  %v616_v0 = vld [vmem:[%s912_s1] sm:$0xff] (!%p210_p10)   ;;  %vm289_vm0 = vcmask (!%p210_p10), 31744   ;;  %v714_v2 = vmov (!%p210_p10), 0   ;;  %v257_v3 = vld [vmem:[%s913_s2 + $0x10] sm:$0xff] (!%p210_p10) }
  0x12   : > { %213 = sbr.rel (%p210_p10) target bundleno = 494 (0x1ee), region = 40  ;;  %p242_p13 = scmp.lt.s32.totalorder (!%p210_p10), %s696_s21, 1  ;;  %527 = vmatprep.mubr.msk.bf16.mxu0 (!%p210_p10), %vm289_vm0, %v616_v0  ;;  %v255_v1 = vld [vmem:[%s913_s2] sm:$0xff] (!%p210_p10)  ;;  %614 = vset.pattern.permute.xlu0 (!%p210_p10), %v714_v2  ;;  %v256_v4 = vld [vmem:[%s913_s2 + $0x8] sm:$0xff] (!%p210_p10)  ;;  %v258_v5 = vld [vmem:[%s913_s2 + $0x18] sm:$0xff] (!%p210_p10)  ;;  %vm296_vm1 = vcmask (!%p210_p10), 1041408  }
  0x13   : > { %s817_s11 = scalar_select %p149_p11, %s692_s20, %s151_s9  }
  0x14   : > { %615 = vset.pattern.permute.xlu1 (!%p210_p10), %v714_v2  ;;  %261 = vperm.xlu0 (!%p210_p10), %614, %v255_v1   ;;  %v356_v8 = vld [vmem:[%s915_s4] sm:$0xf] (!%p210_p10)  ;;  %v617_v10 = vld [vmem:[%s912_s1 + $0x8] sm:$0xff] (!%p210_p10)   ;;  %v715_v11 = vmov (!%p210_p10), 0.0   ;;  %vm716_vm2 = vmmov (!%p210_p10), 0   ;;  %vm362_vm3 = vcmask (!%p210_p10), 261120  }
  0x15   : > { %271 = vperm.xlu1 (!%p210_p10), %615, %v257_v3   ;;  %531 = vmatprep.subr.bf16.mxu1 (!%p210_p10), %v715_v11  ;;  %v353_v30 = vld [vmem:[%s914_s3] sm:$0x3] (!%p210_p10)  ;;  %s515_s9 = sshll.u32 (!%p210_p10), %s700_s22, 1  ;;  %s717_s26 = smov (!%p210_p10), [#allocation2]  }
  0x16   : > { %535 = vmatprep.mubr.msk.bf16.mxu1 (!%p210_p10), %vm716_vm2, %v715_v11  ;;  %s419_s10 = sadd.s32 (!%p210_p10), %s696_s21, %s515_s9  ;;  %s622_s27 = sshll.u32 (!%p210_p10), %s717_s26, 4  ;;  %s623_s27 = int_to_ptr.vmem [resolvable:$false] %s622_s27 }
  0x17   : > { %s516_s12 = sshll.u32 (!%p210_p10), %s419_s10, 6 }
  0x18   : > { %266 = vperm.xlu0 (!%p210_p10), %614, %v256_v4  }
  0x19   : > { %s241_s14 = scalar_select %p240_p12, %s700_s22, 1  ;;  %276 = vperm.xlu1 %615, %v258_v5  }
  0x1a   : > { %s243_s17 = scalar_select %p242_p13, %s696_s21, 1 }
  0x1b   : > { %s507_s30 = sshll.u32 %s241_s14, 1 }
  0x1c   : > { %s245_s8 = sadd.s32 %s507_s30, %s243_s17  ;;  %359 = vperm.xlu0 %614, %v356_v8   ;;  %s237_s30 = sand.u32 1, %s688_s19  }
  0x1d   : > { %s508_s15 = sshll.u32 %s245_s8, 2  ;;  %s506_s8 = sshll.u32 %s237_s30, 2 }
  0x1e   : > { %s247_s28 = scalar_lea.vmem %s911_s0, %s508_s15  ;;  %s239_s13 = scalar_lea.vmem [#allocation2], %s506_s8 }
  0x1f   : > { %v249_v6 = vld [vmem:[%s247_s28] sm:$0xf]  ;;  %s423_s15 = sshll.u32 %s239_s13, 4  ;;  %s858_s17 = scalar_lea.hbm %s916_s5, %s516_s12  ;;  %s860_s15 = int_to_ptr.vmem [resolvable:$true] %s423_s15 }
  0x20   : > { %v250_v7 = vpack.c.bf16 %v249_v6, %v249_v6  ;;  %s408_s21 = scalar_lea.sflag [#allocation3], %s237_s30  ;;  %s618_s22 = scalar_lea.vmem %s860_s15, 64 }
  0x21   : > { %p619_p0 = scmp.ne.s32.totalorder %s860_s15, %s618_s22  ;;  %s624_s28 = scalar_lea.vmem %s623_s27, 128 }
  0x22   : > { %539 = vmatprep.subr.msk.bf16.mxu0 %vm296_vm1, %v250_v7  ;;  %v298_v9 = vsel %vm296_vm1, %v250_v7, 0  ;;  %p625_p4 = scmp.lt.s32.totalorder %s860_s15, %s623_s27  ;;  %p626_p5 = scmp.lt.s32.totalorder %s624_s28, %s618_s22 }
  0x23   : > { %526 = vmatpush3.bf16.msra.mxu0 %v298_v9  ;;  %p620_p1 = pnand %p619_p0, %p799_p3 }
  0x24   : > { %p627_p6 = por %p626_p5, %p625_p4 }
  0x25   : > { %p621_p2 = pneg %p620_p1 }
  0x26   : > { %528 = vmatmul.mubr.msk.bf16.vlgmr.msra.gmra.mrb[0].mxu0 %vm289_vm0, %v617_v10 }
  0x27   : > { %p628_p7 = pnand %p627_p6, %p621_p2 }
  0x93   : > { %v262_v13 = vpop.permute.xlu0 %261 }
  0x94   : > { %v272_v12 = vpop.permute.xlu1 %271 }
  0x97   : > { %v267_v20 = vpop.permute.xlu0 %266 }
  0x98   : > { %v277_v15 = vpop.permute.xlu1 %276 }
  0x9b   : > { %v360_v31 = vpop.permute.xlu0 %359 }
  0xf9   : > { %v529_v14 = vpop.f32.mrb[0].mxu0 }
  0xfa   : > { %v343_v16 = vadd.f32 %v529_v14, %v272_v12  ;;  %v334_v17 = vpop.f32.mrb[1].mxu0 }
  0xfb   : > { %v335_v18 = vadd.f32 %v334_v17, %v262_v13  ;;  %v530_v19 = vpop.f32.mrb[2].mxu0 }
  0xfc   : > { %v346_v21 = vadd.f32 %v530_v19, %v277_v15  ;;  %v337_v22 = vpop.f32.mrb[3].mxu0  ;;  %v351_v24 = vmax.f32 %v343_v16, 0.0 }
  0xfd   : > { %v338_v23 = vadd.f32 %v337_v22, %v267_v20  ;;  %v349_v26 = vmax.f32 %v335_v18, 0.0 }
  0xfe   : > { %v352_v25 = vmax.f32 %v346_v21, 0.0 }
  0xff   : > { %v350_v27 = vmax.f32 %v338_v23, 0.0 }
 0x100   : > { %v355_v28 = vpack.c.bf16 %v352_v25, %v351_v24 }
 0x101   : > { %v354_v29 = vpack.c.bf16 %v350_v27, %v349_v26 }
 0x103   : > { %532 = vmatpush3.bf16.msra.mxu1 %v354_v29 }
 0x104   : > { %533 = vmatprep.subr.bf16.mxu1 %v715_v11 }
 0x107   : > { %534 = vmatpush3.bf16.msra.mxu1 %v355_v28 }
 0x10a   : > { %536 = vmatmul.mubr.msk.bf16.vlgmr.msra.gmra.mrb[0].mxu1 %vm362_vm3, %v353_v30 }
 0x1dd   : > { %v400_v32 = vpop.f32.mrb[0].mxu1 }
 0x1de   : > { %v401_v33 = vadd.f32 %v400_v32, %v360_v31  ;;  %v537_v34 = vpop.f32.mrb[1].mxu1 }
 0x1df   : > { %v403_v35 = vpop.f32.mrb[2].mxu1 }
 0x1e0   : > { %406 = vst [vmem:[%s239_s13] sm:$0xf] %v401_v33  ;;  %v538_v36 = vpop.f32.mrb[3].mxu1 }
 0x1e1   : > { %631 = shalt.err (!%p628_p7)
}
 0x1e2   : > { %s632_s29 = scalar_lea.hbm %s858_s17, 64  ;;  %s636_s9 = scalar_lea.hbm %s916_s5, 256 }
 0x1e3   : > { %p633_p9 = scmp.ne.s32.totalorder %s858_s17, %s632_s29  ;;  %p637_p12 = scmp.lt.u32.totalorder %s858_s17, %s916_s5 }
 0x1e4   : > { %p638_p13 = scmp.lt.u32.totalorder %s636_s9, %s632_s29  ;;  %p640_p1 = scmp.lt.u32.totalorder %s632_s29, %s858_s17 }
 0x1e5   : > { %p634_p10 = pnand %p633_p9, %p799_p3 }
 0x1e6   : > { %p639_p0 = por %p638_p13, %p637_p12 }
 0x1e7   : > { %p635_p11 = pneg %p634_p10 }
 0x1e8   : > { %p641_p2 = por %p640_p1, %p639_p0 }
 0x1ea   : > { %p642_p4 = pnand %p641_p2, %p635_p11 }
 0x1ec   : > { %645 = shalt.err (!%p642_p4)
}
 0x1ed   : > { %540 = dma.vmem_to_hbm [thread:$0]  (%p799_p3), %s860_s15, 64, %s858_s17, %s408_s21  }
 0x1ee PF: > { %p546_p5 = scmp.ge.s32.totalorder %s712_s25, 2  ;;  %s435_s13 = sand.u32 1, %s684_s18  }
 0x1ef   : > { %s436_s16 = scalar_lea.sflag [#allocation3], %s435_s13 }
 0x1f0   : > { %p543_p6 = pnand %p546_p5, %p808_p8 }
 0x1f2   : > { %679 = dma.done.wait (!%p543_p6), %s436_s16, 64  }
 0x1f3   : > { %681 = vsyncadd (!%p543_p6), %s436_s16, 4294967232  ;;  %s18_s25 = sadd.s32 1, %s712_s25   ;;  %s923_s6 = sld [smem:[#allocation5_spill]] }
 0x1f4   : > { %p15_p7 = scmp.ge.s32.totalorder %s18_s25, 6   ;;  %s924_s15 = sld [smem:[#allocation6_spill]] }
 0x1f5   : > { %s925_s18 = smov %s688_s19  ;;  %s926_s19 = smov %s692_s20 }
 0x1f6   : > { %s927_s20 = smov %s817_s11  ;;  %s928_s21 = smov %s704_s23 }
 0x1f7   : > { %s929_s22 = smov %s708_s24  ;;  %17 = sbr.rel (!%p15_p7) target bundleno = 5 (0x5), region = 75 }
 0x1f9   : > { %s930_s23 = smov %s923_s6 }
 0x1fa   : > { %s931_s24 = smov %s924_s15 }
 0x1fe   :  { %441 = vsyncpa [#allocation3], 1 }
 0x1ff   :  { %443 = vsyncpa [#allocation3 + $0x1], 1 }

</bundles_post_ra>
